<compile_context>
chip_gen: v7x
topology: tpu7x:2x2x1
jax: 0.10.0
libtpu: 0.0.40
codegen_flags: <defaults>
</compile_context>

<pallas_src>
import jax
import jax.numpy as jnp
from jax import lax
from jax.experimental import pallas as pl
from jax.experimental.pallas import tpu as pltpu


# --------------------------------------------------------------------------
# Kernels
# --------------------------------------------------------------------------
def _ensemble_kernel_single(x_ref, w_ref, r_ref, b_ref, o_ref):
    """grid=(1,) fast path: whole D reduction in one MXU pass, no scratch.

    x_ref: (B, D)    bf16 input
    w_ref: (D, M*C)  bf16 all member heads, lane-dense
    r_ref: (M*C, C)  f32 member-mean reduction matrix (1/M on matching class)
    b_ref: (1, C)    f32 mean bias
    o_ref: (B, C)    f32 ensemble-averaged output
    """
    acc = jnp.dot(x_ref[...], w_ref[...], preferred_element_type=jnp.float32)
    mean_y = jnp.dot(acc, r_ref[...], preferred_element_type=jnp.float32)
    o_ref[...] = (mean_y + b_ref[...]).astype(o_ref.dtype)


def _ensemble_kernel_ktiled(x_ref, w_ref, r_ref, b_ref, o_ref, acc_ref):
    """Fallback for large D: k-tiled reduction with an f32 VMEM accumulator."""
    k = pl.program_id(0)

    @pl.when(k == 0)
    def _():
        acc_ref[...] = jnp.zeros_like(acc_ref)

    acc_ref[...] += jnp.dot(
        x_ref[...], w_ref[...], preferred_element_type=jnp.float32
    )

    @pl.when(k == pl.num_programs(0) - 1)
    def _():
        mean_y = jnp.dot(
            acc_ref[...], r_ref[...], preferred_element_type=jnp.float32
        )
        o_ref[...] = (mean_y + b_ref[...]).astype(o_ref.dtype)


# --------------------------------------------------------------------------
# Tiling / VMEM budgeting
# --------------------------------------------------------------------------
def _pick_tiling(B, D, MC, C, *, vmem_budget_bytes, tk_max):
    """Pick the k-tile so the double-buffered working set fits the scoped VMEM
    budget.  Default budget is 8 MiB = half of v5e's 16 MiB scoped default;
    v6e/v7x have >= 32 MiB scoped (64/128 MiB physical), so this is safe on all
    generations.  Returns (tk, d_pad, nk)."""

    def vmem_bytes(tk, with_acc):
        return (
            2 * B * tk * 2          # x tile (bf16, double-buffered)
            + 2 * tk * MC * 2       # weight tile (bf16, double-buffered)
            + 2 * MC * C * 4        # reduction matrix (f32)
            + 2 * C * 4             # mean bias
            + 2 * B * C * 4         # output tile
            + B * MC * 4            # in-flight f32 dot result
            + (B * MC * 4 if with_acc else 0)   # f32 accumulator scratch
        )

    # Fast path: whole D in a single grid step (full-array blocks are exempt
    # from the (8, 128) divisibility rule) -> no accumulator, no pl.when.
    if vmem_bytes(D, with_acc=False) <= vmem_budget_bytes:
        return D, D, 1

    # Fallback: largest 128-multiple tile <= tk_max that fits with the acc.
    tk = max(128, min((tk_max // 128) * 128, ((D + 127) // 128) * 128))
    while tk > 128 and vmem_bytes(tk, with_acc=True) > vmem_budget_bytes:
        tk -= 128
    d_pad = ((D + tk - 1) // tk) * tk   # pad so every k-tile is full (zeros)
    return tk, d_pad, d_pad // tk


# --------------------------------------------------------------------------
# One-time (load-time) parameter preparation — hoisted out of the call path.
# --------------------------------------------------------------------------
def prepare_csgmcmc(weights, biases, *, vmem_budget_bytes=8 * 1024 * 1024,
                    tk_max=2048, batch_hint=8, stream_dtype=jnp.bfloat16):
    """Relayout the ensemble parameters once.

    weights: [M, D, C] float32 member head weights
    biases:  [M, 1, C] float32 member head biases
    Returns kernel-ready constants; pass to csgmcmc_forward(x, params).
    """
    M, D, C = weights.shape
    MC = M * C

    # [M, D, C] -> [D, M*C]: all member heads form one lane-dense matmul.
    w_big = jnp.transpose(weights, (1, 0, 2)).reshape(D, MC)

    # mean_m(x@W_m + b_m) == mean_m(x@W_m) + mean_m(b_m): add bias once.
    b_mean = jnp.mean(biases, axis=0).astype(jnp.float32)          # (1, C)

    # Member-mean reduction matrix: r[m*C + c, c'] = 1/M iff c == c'.
    row = lax.broadcasted_iota(jnp.int32, (MC, C), 0)
    col = lax.broadcasted_iota(jnp.int32, (MC, C), 1)
    r = jnp.where((row % C) == col, 1.0 / M, 0.0).astype(jnp.float32)

    tk, d_pad, nk = _pick_tiling(
        batch_hint, D, MC, C,
        vmem_budget_bytes=vmem_budget_bytes, tk_max=tk_max,
    )

    # Stream weights as bf16 (kernel is weight-stream / HBM bound); the kernel
    # accumulates in f32.  Zero-padding of D contributes nothing to the matmul.
    w_big = w_big.astype(stream_dtype)
    if d_pad != D:
        w_big = jnp.pad(w_big, ((0, d_pad - D), (0, 0)))

    return dict(
        w_big=w_big, b_mean=b_mean, r=r,
        tk=tk, d_pad=d_pad, nk=nk,
        M=M, D=D, C=C, MC=MC, stream_dtype=stream_dtype,
    )


# --------------------------------------------------------------------------
# Per-call forward
# --------------------------------------------------------------------------
def csgmcmc_forward(x_nchw, params):
    """Ensemble-averaged forward: mean_m(x_flat @ W_m + b_m) -> [B, C]."""
    B = x_nchw.shape[0]
    D, d_pad, C, MC = params["D"], params["d_pad"], params["C"], params["MC"]
    tk, nk = params["tk"], params["nk"]

    x_flat = x_nchw.reshape(B, -1).astype(params["stream_dtype"])
    if d_pad != D:
        x_flat = jnp.pad(x_flat, ((0, 0), (0, d_pad - D)))

    if nk == 1:
        kernel = _ensemble_kernel_single
        scratch = []
    else:
        kernel = _ensemble_kernel_ktiled
        scratch = [pltpu.VMEM((B, MC), jnp.float32)]

    return pl.pallas_call(
        kernel,
        out_shape=jax.ShapeDtypeStruct((B, C), jnp.float32),
        grid_spec=pltpu.PrefetchScalarGridSpec(
            num_scalar_prefetch=0,
            grid=(nk,),
            in_specs=[
                pl.BlockSpec((B, tk), lambda k: (0, k)),     # input k-tile
                pl.BlockSpec((tk, MC), lambda k: (k, 0)),    # all-member weights
                pl.BlockSpec((MC, C), lambda k: (0, 0)),     # member-mean matrix
                pl.BlockSpec((1, C), lambda k: (0, 0)),      # mean bias
            ],
            out_specs=pl.BlockSpec((B, C), lambda k: (0, 0)),
            scratch_shapes=scratch,
        ),
        compiler_params=pltpu.CompilerParams(
            dimension_semantics=("arbitrary",),   # k is the reduction axis
        ),
    )(x_flat, params["w_big"], params["r"], params["b_mean"])


if __name__ == "__main__":
    key = jax.random.PRNGKey(0)

    # Ensemble structure from cSGMCMC.__init__
    num_modes = 3
    samples_per_mode = 2
    M = num_modes * samples_per_mode

    # Small input consistent with a conv-style NCHW input.
    B, Cin, H, W = 2, 4, 16, 16
    D = Cin * H * W     # 1024
    C = 32              # number of classes / output features per member

    kx, kw, kb = jax.random.split(key, 3)
    x = jax.random.normal(kx, (B, Cin, H, W), dtype=jnp.float32)
    weights = 0.02 * jax.random.normal(kw, (M, D, C), dtype=jnp.float32)
    biases = 0.1 * jax.random.normal(kb, (M, 1, C), dtype=jnp.float32)

    # One-time relayout (load time), then the hot-path call.
    params = prepare_csgmcmc(weights, biases)
    out = csgmcmc_forward(x, params)
    out = jax.block_until_ready(out)

    # Pure-JAX reference: sum(model_m(x) for m) / M, using the same bf16
    # rounding of x / W that the kernel streams (accumulation in f32).
    x32 = x.reshape(B, D).astype(jnp.bfloat16).astype(jnp.float32)
    w32 = weights.astype(jnp.bfloat16).astype(jnp.float32)
    ref = jnp.mean(
        jnp.einsum("bd,mdc->mbc", x32, w32,
                   precision=jax.lax.Precision.HIGHEST) + biases,
        axis=0,
    )
    assert out.shape == (B, C)
    assert jnp.allclose(out, ref, atol=1e-3, rtol=1e-3), "mismatch vs reference"

    print("KERNEL_OK")
</pallas_src>

<mosaic_0001>
module attributes {stable_mosaic.version = 11 : i64} {
  func.func @_ensemble_kernel_single(%arg0: i32, %arg1: memref<2x1024xbf16, #tpu.memory_space<vmem>>, %arg2: memref<1024x192xbf16, #tpu.memory_space<vmem>>, %arg3: memref<192x32xf32, #tpu.memory_space<vmem>>, %arg4: memref<1x32xf32, #tpu.memory_space<vmem>>, %arg5: memref<2x32xf32, #tpu.memory_space<vmem>>) attributes {dimension_semantics = [#tpu.dimension_semantics<arbitrary>], iteration_bounds = array<i64: 1>, scalar_prefetch = 0 : i64, scratch_operands = 0 : i64, tpu.core_type = #tpu.core_type<tc>, window_params = [{transform_indices = @transform_0, window_bounds = array<i64: 2, 1024>}, {transform_indices = @transform_1, window_bounds = array<i64: 1024, 192>}, {pipeline_mode = #tpu.pipeline_mode<synchronous>, transform_indices = @transform_2, window_bounds = array<i64: 192, 32>}, {pipeline_mode = #tpu.pipeline_mode<synchronous>, transform_indices = @transform_3, window_bounds = array<i64: 1, 32>}, {pipeline_mode = #tpu.pipeline_mode<synchronous>, transform_indices = @transform_4, window_bounds = array<i64: 2, 32>}]} {
    %c0 = arith.constant 0 : index
    %c0_0 = arith.constant 0 : index
    %0 = vector.load %arg1[%c0, %c0_0] : memref<2x1024xbf16, #tpu.memory_space<vmem>>, vector<2x1024xbf16>
    %c0_1 = arith.constant 0 : index
    %c0_2 = arith.constant 0 : index
    %1 = vector.load %arg2[%c0_1, %c0_2] : memref<1024x192xbf16, #tpu.memory_space<vmem>>, vector<1024x192xbf16>
    %cst = arith.constant dense<0.000000e+00> : vector<2x192xf32>
    %2 = tpu.matmul %0, %1, %cst {dimension_numbers = #tpu.dot_dimension_numbers<[1], [0], [0], [1], [0, 0, 1, 1], [], []>} : vector<2x1024xbf16>, vector<1024x192xbf16>, vector<2x192xf32> -> vector<2x192xf32>
    %c0_3 = arith.constant 0 : index
    %c0_4 = arith.constant 0 : index
    %3 = vector.load %arg3[%c0_3, %c0_4] : memref<192x32xf32, #tpu.memory_space<vmem>>, vector<192x32xf32>
    %cst_5 = arith.constant dense<0.000000e+00> : vector<2x32xf32>
    %4 = tpu.matmul %2, %3, %cst_5 {dimension_numbers = #tpu.dot_dimension_numbers<[1], [0], [0], [1], [0, 0, 1, 1], [], []>} : vector<2x192xf32>, vector<192x32xf32>, vector<2x32xf32> -> vector<2x32xf32>
    %c0_6 = arith.constant 0 : index
    %c0_7 = arith.constant 0 : index
    %5 = vector.load %arg4[%c0_6, %c0_7] : memref<1x32xf32, #tpu.memory_space<vmem>>, vector<1x32xf32>
    %6 = vector.broadcast %5 : vector<1x32xf32> to vector<2x32xf32>
    %7 = arith.addf %4, %6 : vector<2x32xf32>
    %c0_8 = arith.constant 0 : index
    %c0_9 = arith.constant 0 : index
    %8 = vector.load %arg5[%c0_8, %c0_9] : memref<2x32xf32, #tpu.memory_space<vmem>>, vector<2x32xf32>
    tpu.vector_store %arg5[%c0_8, %c0_9], %7 {strides = array<i32>} : memref<2x32xf32, #tpu.memory_space<vmem>>, vector<2x32xf32>,
    return
  }
  func.func @transform_0(%arg0: i32) -> (i32, i32) {
    %c0_i32 = arith.constant 0 : i32
    %c0_i32_0 = arith.constant 0 : i32
    return %c0_i32, %arg0 : i32, i32
  }
  func.func @transform_1(%arg0: i32) -> (i32, i32) {
    %c0_i32 = arith.constant 0 : i32
    %c0_i32_0 = arith.constant 0 : i32
    return %arg0, %c0_i32 : i32, i32
  }
  func.func @transform_2(%arg0: i32) -> (i32, i32) {
    %c0_i32 = arith.constant 0 : i32
    %c0_i32_0 = arith.constant 0 : i32
    %c0_i32_1 = arith.constant 0 : i32
    return %c0_i32, %c0_i32_0 : i32, i32
  }
  func.func @transform_3(%arg0: i32) -> (i32, i32) {
    %c0_i32 = arith.constant 0 : i32
    %c0_i32_0 = arith.constant 0 : i32
    %c0_i32_1 = arith.constant 0 : i32
    return %c0_i32, %c0_i32_0 : i32, i32
  }
  func.func @transform_4(%arg0: i32) -> (i32, i32) {
    %c0_i32 = arith.constant 0 : i32
    %c0_i32_0 = arith.constant 0 : i32
    %c0_i32_1 = arith.constant 0 : i32
    return %c0_i32, %c0_i32_0 : i32, i32
  }
}

</mosaic_0001>

<bundles_post_ra>
// kernel: tpu_custom_call.1
= control target key start
LH: loop header
LB: loop body
LE: loop exit
PB: predicated region body
PF: predicated region fallthrough
CT: control target
= control target key end

     0   :  { %v1526_v36 = vmov 1966171168   ;;  %v152_v38 = vlaneseq  ;;  %s2038_s0 = inlined_call_operand.vmem [shape: bf16[2,1024], index: 0, kind: input, shape index: {}]   ;;  %s2039_s1 = inlined_call_operand.vmem [shape: bf16[1024,192], index: 1, kind: input, shape index: {}]   ;;  %s2040_s2 = inlined_call_operand.vmem [shape: f32[192,32], index: 2, kind: input, shape index: {}]   ;;  %s2041_s3 = inlined_call_operand.vmem [shape: f32[1,32], index: 3, kind: input, shape index: {}]   ;;  %s2042_s4 = inlined_call_operand.hbm [shape: f32[2,32], index: 4, kind: output, shape index: {}]  }
   0x1   :  { %v1309_v0 = vld [vmem:[%s2039_s1 + $0x4] ss:$8 sps:$4 sm:$0xff]   ;;  %v1313_v2 = vld [vmem:[%s2039_s1] ss:$8 sps:$4 sm:$0xff]   ;;  %v1315_v4 = vld [vmem:[%s2039_s1 + $0x14] ss:$8 sps:$4 sm:$0xff]   ;;  %v150_v37 = vunpack.c.l.s4 %v1526_v36 }
   0x2   :  { %v1311_v1 = vld [vmem:[%s2039_s1 + $0x204] ss:$8 sps:$4 sm:$0xff]   ;;  %845 = vmatprep.subr.bf16.mxu1 %v1309_v0  ;;  %v1314_v3 = vld [vmem:[%s2039_s1 + $0x200] ss:$8 sps:$4 sm:$0xff]   ;;  %v1317_v5 = vld [vmem:[%s2039_s1 + $0x214] ss:$8 sps:$4 sm:$0xff]  }
   0x3   :  { %927 = vmatprep.subr.bf16.mxu0 %v1311_v1  ;;  %846 = vmatpush1.bf16.msra.mxu1 %v1313_v2  ;;  %v1319_v6 = vld [vmem:[%s2039_s1 + $0x10] ss:$8 sps:$4 sm:$0xff]   ;;  %v1321_v8 = vld [vmem:[%s2039_s1 + $0x24] ss:$8 sps:$4 sm:$0xff]   ;;  %v1325_v10 = vld [vmem:[%s2039_s1 + $0x20] ss:$8 sps:$4 sm:$0xff]   ;;  %v151_v42 = vunpack.c.0.s8 %v150_v37 }
   0x4   :  { %928 = vmatpush1.bf16.msra.mxu0 %v1314_v3  ;;  %847 = vmatprep.subr.bf16.mxu1 %v1315_v4  ;;  %v1320_v7 = vld [vmem:[%s2039_s1 + $0x210] ss:$8 sps:$4 sm:$0xff]   ;;  %v1323_v9 = vld [vmem:[%s2039_s1 + $0x224] ss:$8 sps:$4 sm:$0xff]   ;;  %v1326_v11 = vld [vmem:[%s2039_s1 + $0x220] ss:$8 sps:$4 sm:$0xff]  }
   0x5   :  { %929 = vmatprep.subr.bf16.mxu0 %v1317_v5  ;;  %v1327_v12 = vld [vmem:[%s2039_s1 + $0x34] ss:$8 sps:$4 sm:$0xff]   ;;  %v1331_v14 = vld [vmem:[%s2039_s1 + $0x30] ss:$8 sps:$4 sm:$0xff]   ;;  %v1333_v16 = vld [vmem:[%s2039_s1 + $0x44] ss:$8 sps:$4 sm:$0xff]  }
   0x6   :  { %v1329_v13 = vld [vmem:[%s2039_s1 + $0x234] ss:$8 sps:$4 sm:$0xff]   ;;  %v1332_v15 = vld [vmem:[%s2039_s1 + $0x230] ss:$8 sps:$4 sm:$0xff]   ;;  %v1335_v17 = vld [vmem:[%s2039_s1 + $0x244] ss:$8 sps:$4 sm:$0xff]  }
   0x7   :  { %848 = vmatpush1.bf16.msra.mxu1 %v1319_v6  ;;  %v1337_v18 = vld [vmem:[%s2039_s1 + $0x40] ss:$8 sps:$4 sm:$0xff]   ;;  %v1339_v20 = vld [vmem:[%s2039_s1 + $0x54] ss:$8 sps:$4 sm:$0xff]   ;;  %v1343_v22 = vld [vmem:[%s2039_s1 + $0x50] ss:$8 sps:$4 sm:$0xff]  }
   0x8   :  { %930 = vmatpush1.bf16.msra.mxu0 %v1320_v7  ;;  %849 = vmatprep.subr.bf16.mxu1 %v1321_v8  ;;  %v1338_v19 = vld [vmem:[%s2039_s1 + $0x240] ss:$8 sps:$4 sm:$0xff]   ;;  %v1341_v21 = vld [vmem:[%s2039_s1 + $0x254] ss:$8 sps:$4 sm:$0xff]   ;;  %v1344_v23 = vld [vmem:[%s2039_s1 + $0x250] ss:$8 sps:$4 sm:$0xff]  }
   0x9   :  { %931 = vmatprep.subr.bf16.mxu0 %v1323_v9  ;;  %v1345_v24 = vld [vmem:[%s2039_s1 + $0x64] ss:$8 sps:$4 sm:$0xff]   ;;  %v1349_v26 = vld [vmem:[%s2039_s1 + $0x60] ss:$8 sps:$4 sm:$0xff]   ;;  %v1351_v28 = vld [vmem:[%s2039_s1 + $0x74] ss:$8 sps:$4 sm:$0xff]  }
   0xa   :  { %v1347_v25 = vld [vmem:[%s2039_s1 + $0x264] ss:$8 sps:$4 sm:$0xff]   ;;  %v1350_v27 = vld [vmem:[%s2039_s1 + $0x260] ss:$8 sps:$4 sm:$0xff]   ;;  %v1353_v29 = vld [vmem:[%s2039_s1 + $0x274] ss:$8 sps:$4 sm:$0xff]  }
   0xb   :  { %850 = vmatpush1.bf16.msra.mxu1 %v1325_v10  ;;  %v1355_v30 = vld [vmem:[%s2039_s1 + $0x70] ss:$8 sps:$4 sm:$0xff]   ;;  %v1357_v32 = vld [vmem:[%s2039_s1 + $0x84] ss:$8 sps:$4 sm:$0xff]   ;;  %v1361_v34 = vld [vmem:[%s2039_s1 + $0x80] ss:$8 sps:$4 sm:$0xff]  }
   0xc   :  { %932 = vmatpush1.bf16.msra.mxu0 %v1326_v11  ;;  %851 = vmatprep.subr.bf16.mxu1 %v1327_v12  ;;  %v1356_v31 = vld [vmem:[%s2039_s1 + $0x270] ss:$8 sps:$4 sm:$0xff]   ;;  %v1359_v33 = vld [vmem:[%s2039_s1 + $0x284] ss:$8 sps:$4 sm:$0xff]   ;;  %v1362_v35 = vld [vmem:[%s2039_s1 + $0x280] ss:$8 sps:$4 sm:$0xff]  }
   0xd   :  { %933 = vmatprep.subr.bf16.mxu0 %v1329_v13  ;;  %v1363_v39 = vld [vmem:[%s2039_s1 + $0x94] ss:$8 sps:$4 sm:$0xff]   ;;  %v1367_v41 = vld [vmem:[%s2039_s1 + $0x90] ss:$8 sps:$4 sm:$0xff]   ;;  %v153_v43 = vshrl.u32 %v152_v38, 7  ;;  %v18_v52 = vld [vmem:[%s2038_s0] sm:$0xff] }
   0xe   :  { %v1365_v40 = vld [vmem:[%s2039_s1 + $0x294] ss:$8 sps:$4 sm:$0xff]   ;;  %v1368_v44 = vld [vmem:[%s2039_s1 + $0x290] ss:$8 sps:$4 sm:$0xff]   ;;  %v1369_v45 = vld [vmem:[%s2039_s1 + $0xa4] ss:$8 sps:$4 sm:$0xff]   ;;  %v148_v55 = vcombine.high %v18_v52, %v18_v52 }
   0xf   :  { %852 = vmatpush1.bf16.msra.mxu1 %v1331_v14  ;;  %v1371_v46 = vld [vmem:[%s2039_s1 + $0x2a4] ss:$8 sps:$4 sm:$0xff]   ;;  %v1373_v47 = vld [vmem:[%s2039_s1 + $0xa0] ss:$8 sps:$4 sm:$0xff]   ;;  %v154_v49 = vsub.s32 %v151_v42, %v153_v43  ;;  %v1375_v50 = vld [vmem:[%s2039_s1 + $0xb4] ss:$8 sps:$4 sm:$0xff]  }
  0x10   :  { %934 = vmatpush1.bf16.msra.mxu0 %v1332_v15  ;;  %853 = vmatprep.subr.bf16.mxu1 %v1333_v16  ;;  %v1374_v48 = vld [vmem:[%s2039_s1 + $0x2a0] ss:$8 sps:$4 sm:$0xff]   ;;  %v1377_v51 = vld [vmem:[%s2039_s1 + $0x2b4] ss:$8 sps:$4 sm:$0xff]   ;;  %v1379_v53 = vld [vmem:[%s2039_s1 + $0xb0] ss:$8 sps:$4 sm:$0xff]  }
  0x11   :  { %935 = vmatprep.subr.bf16.mxu0 %v1335_v17  ;;  %v155_v54 = vrot.slane %v18_v52, %v154_v49  ;;  %v1380_v56 = vld [vmem:[%s2039_s1 + $0x2b0] ss:$8 sps:$4 sm:$0xff]   ;;  %v1381_v57 = vld [vmem:[%s2039_s1 + $0xc4] ss:$8 sps:$4 sm:$0xff]   ;;  %v162_v60 = vrot.slane %v148_v55, %v154_v49  ;;  %v1385_v61 = vld [vmem:[%s2039_s1 + $0xc0] ss:$8 sps:$4 sm:$0xff]  }
  0x12   :  { %v1383_v58 = vld [vmem:[%s2039_s1 + $0x2c4] ss:$8 sps:$4 sm:$0xff]   ;;  %v1386_v0 = vld [vmem:[%s2039_s1 + $0x2c0] ss:$8 sps:$4 sm:$0xff]   ;;  %v1387_v1 = vld [vmem:[%s2039_s1 + $0xd4] ss:$8 sps:$4 sm:$0xff]  }
  0x13   :  { %854 = vmatpush1.bf16.msra.mxu1 %v1337_v18  ;;  %v163_v59 = vcombine.high %v155_v54, %v155_v54  ;;  %v164_v63 = vcombine.high %v162_v60, %v162_v60  ;;  %v1389_v2 = vld [vmem:[%s2039_s1 + $0x2d4] ss:$8 sps:$4 sm:$0xff]   ;;  %v1391_v4 = vld [vmem:[%s2039_s1 + $0xd0] ss:$8 sps:$4 sm:$0xff]   ;;  %v1393_v6 = vld [vmem:[%s2039_s1 + $0xe4] ss:$8 sps:$4 sm:$0xff]   ;;  %v1758_v17 = vrot.slane %v155_v54, %v154_v49  ;;  %v1760_v18 = vrot.slane %v162_v60, %v154_v49 }
  0x14   :  { %936 = vmatpush1.bf16.msra.mxu0 %v1338_v19  ;;  %855 = vmatprep.subr.bf16.mxu1 %v1339_v20  ;;  %v1392_v5 = vld [vmem:[%s2039_s1 + $0x2d0] ss:$8 sps:$4 sm:$0xff]   ;;  %v1395_v7 = vld [vmem:[%s2039_s1 + $0x2e4] ss:$8 sps:$4 sm:$0xff]   ;;  %v1397_v8 = vld [vmem:[%s2039_s1 + $0xe0] ss:$8 sps:$4 sm:$0xff]  }
  0x15   :  { %937 = vmatprep.subr.bf16.mxu0 %v1341_v21  ;;  %v185_v62 = vrot.slane %v163_v59, %v154_v49  ;;  %v192_v3 = vrot.slane %v164_v63, %v154_v49  ;;  %v1398_v9 = vld [vmem:[%s2039_s1 + $0x2e0] ss:$8 sps:$4 sm:$0xff]   ;;  %v1399_v10 = vld [vmem:[%s2039_s1 + $0xf4] ss:$8 sps:$4 sm:$0xff]   ;;  %v1403_v12 = vld [vmem:[%s2039_s1 + $0xf0] ss:$8 sps:$4 sm:$0xff]  }
  0x16   :  { %v1401_v11 = vld [vmem:[%s2039_s1 + $0x2f4] ss:$8 sps:$4 sm:$0xff]   ;;  %v1404_v13 = vld [vmem:[%s2039_s1 + $0x2f0] ss:$8 sps:$4 sm:$0xff]   ;;  %v1407_v14 = vld [vmem:[%s2039_s1 + $0x104] ss:$8 sps:$4 sm:$0xff]  }
  0x17   :  { %856 = vmatpush1.bf16.msra.mxu1 %v1343_v22  ;;  %877 = vmatprep.mubr.bf16.mxu1 %v185_v62  ;;  %v1411_v15 = vld [vmem:[%s2039_s1 + $0x304] ss:$8 sps:$4 sm:$0xff]   ;;  %v1405_v16 = vld [vmem:[%s2039_s1 + $0x100] ss:$8 sps:$4 sm:$0xff]   ;;  %v1414_v20 = vld [vmem:[%s2039_s1 + $0x114] ss:$8 sps:$4 sm:$0xff]   ;;  %v195_v22 = vcombine.high %v185_v62, %v185_v62 }
  0x18   :  { %938 = vmatpush1.bf16.msra.mxu0 %v1344_v23  ;;  %857 = vmatprep.subr.bf16.mxu1 %v1345_v24  ;;  %v1409_v19 = vld [vmem:[%s2039_s1 + $0x300] ss:$8 sps:$4 sm:$0xff]   ;;  %v1417_v21 = vld [vmem:[%s2039_s1 + $0x314] ss:$8 sps:$4 sm:$0xff]   ;;  %v196_v23 = vcombine.high %v192_v3, %v192_v3  ;;  %v1412_v24 = vld [vmem:[%s2039_s1 + $0x110] ss:$8 sps:$4 sm:$0xff]  }
  0x19   :  { %939 = vmatprep.subr.bf16.mxu0 %v1347_v25  ;;  %959 = vmatprep.mubr.bf16.mxu0 %v192_v3  ;;  %v1415_v25 = vld [vmem:[%s2039_s1 + $0x310] ss:$8 sps:$4 sm:$0xff]   ;;  %v1430_v36 = vld [vmem:[%s2039_s1 + $0x140] ss:$8 sps:$4 sm:$0xff]   ;;  %v1438_v38 = vld [vmem:[%s2039_s1 + $0x154] ss:$8 sps:$4 sm:$0xff]  }
  0x1a   :  { %v1433_v37 = vld [vmem:[%s2039_s1 + $0x340] ss:$8 sps:$4 sm:$0xff]   ;;  %v1444_v42 = vld [vmem:[%s2039_s1 + $0x164] ss:$8 sps:$4 sm:$0xff]   ;;  %v1451_v49 = vld [vmem:[%s2039_s1 + $0x370] ss:$8 sps:$4 sm:$0xff]  }
  0x1b   :  { %858 = vmatpush1.bf16.msra.mxu1 %v1349_v26  ;;  %v1420_v26 = vld [vmem:[%s2039_s1 + $0x124] ss:$8 sps:$4 sm:$0xff]  }
  0x1c   :  { %940 = vmatpush1.bf16.msra.mxu0 %v1350_v27  ;;  %859 = vmatprep.subr.bf16.mxu1 %v1351_v28  ;;  %v1423_v27 = vld [vmem:[%s2039_s1 + $0x324] ss:$8 sps:$4 sm:$0xff]   ;;  %v1418_v28 = vld [vmem:[%s2039_s1 + $0x120] ss:$8 sps:$4 sm:$0xff]  }
  0x1d   :  { %941 = vmatprep.subr.bf16.mxu0 %v1353_v29  ;;  %v1421_v29 = vld [vmem:[%s2039_s1 + $0x320] ss:$8 sps:$4 sm:$0xff]   ;;  %v1447_v43 = vld [vmem:[%s2039_s1 + $0x364] ss:$8 sps:$4 sm:$0xff]  }
  0x1f   :  { %860 = vmatpush1.bf16.msra.mxu1 %v1355_v30  ;;  %v1426_v30 = vld [vmem:[%s2039_s1 + $0x134] ss:$8 sps:$4 sm:$0xff]  }
  0x20   :  { %942 = vmatpush1.bf16.msra.mxu0 %v1356_v31  ;;  %861 = vmatprep.subr.bf16.mxu1 %v1357_v32  ;;  %v1429_v31 = vld [vmem:[%s2039_s1 + $0x334] ss:$8 sps:$4 sm:$0xff]   ;;  %v1424_v32 = vld [vmem:[%s2039_s1 + $0x130] ss:$8 sps:$4 sm:$0xff]  }
  0x21   :  { %943 = vmatprep.subr.bf16.mxu0 %v1359_v33  ;;  %v1427_v33 = vld [vmem:[%s2039_s1 + $0x330] ss:$8 sps:$4 sm:$0xff]  }
  0x23   :  { %862 = vmatpush1.bf16.msra.mxu1 %v1361_v34  ;;  %v1432_v34 = vld [vmem:[%s2039_s1 + $0x144] ss:$8 sps:$4 sm:$0xff]  }
  0x24   :  { %944 = vmatpush1.bf16.msra.mxu0 %v1362_v35  ;;  %863 = vmatprep.subr.bf16.mxu1 %v1363_v39  ;;  %v1435_v35 = vld [vmem:[%s2039_s1 + $0x344] ss:$8 sps:$4 sm:$0xff]   ;;  %v1441_v39 = vld [vmem:[%s2039_s1 + $0x354] ss:$8 sps:$4 sm:$0xff]  }
  0x25   :  { %945 = vmatprep.subr.bf16.mxu0 %v1365_v40  ;;  %v1436_v40 = vld [vmem:[%s2039_s1 + $0x150] ss:$8 sps:$4 sm:$0xff]  }
  0x27   :  { %864 = vmatpush1.bf16.msra.mxu1 %v1367_v41  ;;  %v1439_v41 = vld [vmem:[%s2039_s1 + $0x350] ss:$8 sps:$4 sm:$0xff]  }
  0x28   :  { %946 = vmatpush1.bf16.msra.mxu0 %v1368_v44  ;;  %865 = vmatprep.subr.bf16.mxu1 %v1369_v45  ;;  %v1442_v44 = vld [vmem:[%s2039_s1 + $0x160] ss:$8 sps:$4 sm:$0xff]  }
  0x29   :  { %947 = vmatprep.subr.bf16.mxu0 %v1371_v46  ;;  %v1445_v45 = vld [vmem:[%s2039_s1 + $0x360] ss:$8 sps:$4 sm:$0xff]   ;;  %v1450_v46 = vld [vmem:[%s2039_s1 + $0x174] ss:$8 sps:$4 sm:$0xff]  }
  0x2b   :  { %866 = vmatpush1.bf16.msra.mxu1 %v1373_v47  ;;  %v1453_v47 = vld [vmem:[%s2039_s1 + $0x374] ss:$8 sps:$4 sm:$0xff]  }
  0x2c   :  { %948 = vmatpush1.bf16.msra.mxu0 %v1374_v48  ;;  %867 = vmatprep.subr.bf16.mxu1 %v1375_v50  ;;  %v1448_v48 = vld [vmem:[%s2039_s1 + $0x170] ss:$8 sps:$4 sm:$0xff]   ;;  %v1456_v50 = vld [vmem:[%s2039_s1 + $0x184] ss:$8 sps:$4 sm:$0xff]  }
  0x2d   :  { %949 = vmatprep.subr.bf16.mxu0 %v1377_v51  ;;  %v1459_v51 = vld [vmem:[%s2039_s1 + $0x384] ss:$8 sps:$4 sm:$0xff]  }
  0x2f   :  { %868 = vmatpush1.bf16.msra.mxu1 %v1379_v53 }
  0x30   :  { %950 = vmatpush1.bf16.msra.mxu0 %v1380_v56  ;;  %869 = vmatprep.subr.bf16.mxu1 %v1381_v57 }
  0x31   :  { %951 = vmatprep.subr.bf16.mxu0 %v1383_v58 }
  0x33   :  { %870 = vmatpush1.bf16.msra.mxu1 %v1385_v61 }
  0x34   :  { %952 = vmatpush1.bf16.msra.mxu0 %v1386_v0  ;;  %871 = vmatprep.subr.bf16.mxu1 %v1387_v1 }
  0x35   :  { %953 = vmatprep.subr.bf16.mxu0 %v1389_v2 }
  0x37   :  { %872 = vmatpush1.bf16.msra.mxu1 %v1391_v4 }
  0x38   :  { %954 = vmatpush1.bf16.msra.mxu0 %v1392_v5  ;;  %873 = vmatprep.subr.bf16.mxu1 %v1393_v6 }
  0x39   :  { %955 = vmatprep.subr.bf16.mxu0 %v1395_v7 }
  0x3b   :  { %874 = vmatpush1.bf16.msra.mxu1 %v1397_v8 }
  0x3c   :  { %956 = vmatpush1.bf16.msra.mxu0 %v1398_v9  ;;  %875 = vmatprep.subr.bf16.mxu1 %v1399_v10 }
  0x3d   :  { %957 = vmatprep.subr.bf16.mxu0 %v1401_v11 }
  0x3f   :  { %876 = vmatpush1.bf16.msra.mxu1 %v1403_v12 }
  0x40   :  { %958 = vmatpush1.bf16.msra.mxu0 %v1404_v13  ;;  %886 = vmatprep.subr.bf16.mxu1 %v1407_v14 }
  0x41   :  { %968 = vmatprep.subr.bf16.mxu0 %v1411_v15 }
  0x42   :  { %878 = vmatmul.mubr.bf16.vlgmr.msra.gmra.mrb[0].mxu1 %v1758_v17 }
  0x43   :  { %960 = vmatmul.mubr.bf16.vlgmr.msra.gmra.mrb[0].mxu0 %v1760_v18  ;;  %887 = vmatpush1.bf16.msra.mxu1 %v1405_v16 }
  0x44   :  { %969 = vmatpush1.bf16.msra.mxu0 %v1409_v19  ;;  %888 = vmatprep.subr.bf16.mxu1 %v1414_v20 }
  0x45   :  { %970 = vmatprep.subr.bf16.mxu0 %v1417_v21  ;;  %918 = vmatprep.mubr.bf16.mxu1 %v195_v22 }
  0x46   :  { %1000 = vmatprep.mubr.bf16.mxu0 %v196_v23 }
  0x47   :  { %889 = vmatpush1.bf16.msra.mxu1 %v1412_v24 }
  0x48   :  { %971 = vmatpush1.bf16.msra.mxu0 %v1415_v25  ;;  %890 = vmatprep.subr.bf16.mxu1 %v1420_v26 }
  0x49   :  { %972 = vmatprep.subr.bf16.mxu0 %v1423_v27 }
  0x4b   :  { %891 = vmatpush1.bf16.msra.mxu1 %v1418_v28 }
  0x4c   :  { %973 = vmatpush1.bf16.msra.mxu0 %v1421_v29  ;;  %892 = vmatprep.subr.bf16.mxu1 %v1426_v30 }
  0x4d   :  { %974 = vmatprep.subr.bf16.mxu0 %v1429_v31 }
  0x4f   :  { %893 = vmatpush1.bf16.msra.mxu1 %v1424_v32 }
  0x50   :  { %975 = vmatpush1.bf16.msra.mxu0 %v1427_v33  ;;  %894 = vmatprep.subr.bf16.mxu1 %v1432_v34 }
  0x51   :  { %976 = vmatprep.subr.bf16.mxu0 %v1435_v35 }
  0x53   :  { %895 = vmatpush1.bf16.msra.mxu1 %v1430_v36 }
  0x54   :  { %977 = vmatpush1.bf16.msra.mxu0 %v1433_v37  ;;  %896 = vmatprep.subr.bf16.mxu1 %v1438_v38 }
  0x55   :  { %978 = vmatprep.subr.bf16.mxu0 %v1441_v39 }
  0x57   :  { %897 = vmatpush1.bf16.msra.mxu1 %v1436_v40 }
  0x58   :  { %979 = vmatpush1.bf16.msra.mxu0 %v1439_v41  ;;  %898 = vmatprep.subr.bf16.mxu1 %v1444_v42 }
  0x59   :  { %980 = vmatprep.subr.bf16.mxu0 %v1447_v43 }
  0x5b   :  { %899 = vmatpush1.bf16.msra.mxu1 %v1442_v44 }
  0x5c   :  { %981 = vmatpush1.bf16.msra.mxu0 %v1445_v45  ;;  %900 = vmatprep.subr.bf16.mxu1 %v1450_v46 }
  0x5d   :  { %982 = vmatprep.subr.bf16.mxu0 %v1453_v47 }
  0x5e   :  { %9 = vsyncpa [#allocation3], 0  ;;  %v1454_v52 = vld [vmem:[%s2039_s1 + $0x180] ss:$8 sps:$4 sm:$0xff]   ;;  %v1462_v54 = vld [vmem:[%s2039_s1 + $0x194] ss:$8 sps:$4 sm:$0xff]   ;;  %v193_v22 = vcombine.high %v1758_v17, %v1758_v17  ;;  %v194_v23 = vcombine.high %v1760_v18, %v1760_v18 }
  0x5f   :  { %901 = vmatpush1.bf16.msra.mxu1 %v1448_v48  ;;  %v1457_v53 = vld [vmem:[%s2039_s1 + $0x380] ss:$8 sps:$4 sm:$0xff]   ;;  %v1465_v55 = vld [vmem:[%s2039_s1 + $0x394] ss:$8 sps:$4 sm:$0xff]   ;;  %v1460_v56 = vld [vmem:[%s2039_s1 + $0x190] ss:$8 sps:$4 sm:$0xff]  }
  0x60   :  { %983 = vmatpush1.bf16.msra.mxu0 %v1451_v49  ;;  %902 = vmatprep.subr.bf16.mxu1 %v1456_v50  ;;  %v1463_v57 = vld [vmem:[%s2039_s1 + $0x390] ss:$8 sps:$4 sm:$0xff]   ;;  %v1468_v58 = vld [vmem:[%s2039_s1 + $0x1a4] ss:$8 sps:$4 sm:$0xff]   ;;  %v1466_v60 = vld [vmem:[%s2039_s1 + $0x1a0] ss:$8 sps:$4 sm:$0xff]  }
  0x61   :  { %984 = vmatprep.subr.bf16.mxu0 %v1459_v51  ;;  %v1471_v59 = vld [vmem:[%s2039_s1 + $0x3a4] ss:$8 sps:$4 sm:$0xff]   ;;  %v1469_v61 = vld [vmem:[%s2039_s1 + $0x3a0] ss:$8 sps:$4 sm:$0xff]   ;;  %v1474_v62 = vld [vmem:[%s2039_s1 + $0x1b4] ss:$8 sps:$4 sm:$0xff]  }
  0x62   :  { %v1477_v63 = vld [vmem:[%s2039_s1 + $0x3b4] ss:$8 sps:$4 sm:$0xff]   ;;  %v1472_v0 = vld [vmem:[%s2039_s1 + $0x1b0] ss:$8 sps:$4 sm:$0xff]   ;;  %v1480_v2 = vld [vmem:[%s2039_s1 + $0x1c4] ss:$8 sps:$4 sm:$0xff]  }
  0x63   :  { %903 = vmatpush1.bf16.msra.mxu1 %v1454_v52  ;;  %v1475_v1 = vld [vmem:[%s2039_s1 + $0x3b0] ss:$8 sps:$4 sm:$0xff]   ;;  %v1483_v3 = vld [vmem:[%s2039_s1 + $0x3c4] ss:$8 sps:$4 sm:$0xff]   ;;  %v1478_v4 = vld [vmem:[%s2039_s1 + $0x1c0] ss:$8 sps:$4 sm:$0xff]  }
  0x64   :  { %985 = vmatpush1.bf16.msra.mxu0 %v1457_v53  ;;  %904 = vmatprep.subr.bf16.mxu1 %v1462_v54  ;;  %v1481_v5 = vld [vmem:[%s2039_s1 + $0x3c0] ss:$8 sps:$4 sm:$0xff]   ;;  %v1486_v6 = vld [vmem:[%s2039_s1 + $0x1d4] ss:$8 sps:$4 sm:$0xff]   ;;  %v1484_v8 = vld [vmem:[%s2039_s1 + $0x1d0] ss:$8 sps:$4 sm:$0xff]  }
  0x65   :  { %986 = vmatprep.subr.bf16.mxu0 %v1465_v55  ;;  %v1489_v7 = vld [vmem:[%s2039_s1 + $0x3d4] ss:$8 sps:$4 sm:$0xff]   ;;  %v1487_v9 = vld [vmem:[%s2039_s1 + $0x3d0] ss:$8 sps:$4 sm:$0xff]   ;;  %v1492_v10 = vld [vmem:[%s2039_s1 + $0x1e4] ss:$8 sps:$4 sm:$0xff]  }
  0x66   :  { %v1495_v11 = vld [vmem:[%s2039_s1 + $0x3e4] ss:$8 sps:$4 sm:$0xff]   ;;  %v1490_v12 = vld [vmem:[%s2039_s1 + $0x1e0] ss:$8 sps:$4 sm:$0xff]   ;;  %v1498_v14 = vld [vmem:[%s2039_s1 + $0x1f4] ss:$8 sps:$4 sm:$0xff]  }
  0x67   :  { %905 = vmatpush1.bf16.msra.mxu1 %v1460_v56  ;;  %v1493_v13 = vld [vmem:[%s2039_s1 + $0x3e0] ss:$8 sps:$4 sm:$0xff]   ;;  %v1501_v15 = vld [vmem:[%s2039_s1 + $0x3f4] ss:$8 sps:$4 sm:$0xff]   ;;  %v1496_v16 = vld [vmem:[%s2039_s1 + $0x1f0] ss:$8 sps:$4 sm:$0xff]  }
  0x68   :  { %987 = vmatpush1.bf16.msra.mxu0 %v1463_v57  ;;  %906 = vmatprep.subr.bf16.mxu1 %v1468_v58  ;;  %v1499_v19 = vld [vmem:[%s2039_s1 + $0x3f0] ss:$8 sps:$4 sm:$0xff]   ;;  %v1009_v20 = vld [vmem:[%s2040_s2] sm:$0xff]  ;;  %v1010_v21 = vld [vmem:[%s2040_s2 + $0x8] sm:$0xff]  ;;  %v1527_v25 = vmov 0.0|0.0   ;;  %vm1040_vm0 = vcmask 523264  }
  0x69   :  { %988 = vmatprep.subr.bf16.mxu0 %v1471_v59  ;;  %v1261_v24 = vpack.c.bf16 %v1010_v21, %v1009_v20  ;;  %v1011_v26 = vld [vmem:[%s2040_s2 + $0x10] sm:$0xff]  ;;  %v1012_v27 = vld [vmem:[%s2040_s2 + $0x18] sm:$0xff]  ;;  %v1013_v18 = vld [vmem:[%s2040_s2 + $0x20] sm:$0xff]  ;;  %vm1114_vm1 = vcmask 254976  }
  0x6a   :  { %v1264_v17 = vpack.c.bf16 %v1012_v27, %v1011_v26  ;;  %v1014_v28 = vld [vmem:[%s2040_s2 + $0x28] sm:$0xff]  ;;  %v1015_v30 = vld [vmem:[%s2040_s2 + $0x30] sm:$0xff]  ;;  %v1016_v31 = vld [vmem:[%s2040_s2 + $0x38] sm:$0xff] }
  0x6b   :  { %907 = vmatpush1.bf16.msra.mxu1 %v1466_v60  ;;  %v1267_v29 = vpack.c.bf16 %v1014_v28, %v1013_v18  ;;  %v1270_v32 = vpack.c.bf16 %v1016_v31, %v1015_v30  ;;  %v1017_v33 = vld [vmem:[%s2040_s2 + $0x40] sm:$0xff]  ;;  %v1018_v34 = vld [vmem:[%s2040_s2 + $0x48] sm:$0xff]  ;;  %v1019_v36 = vld [vmem:[%s2040_s2 + $0x50] sm:$0xff] }
  0x6c   :  { %989 = vmatpush1.bf16.msra.mxu0 %v1469_v61  ;;  %908 = vmatprep.subr.bf16.mxu1 %v1474_v62  ;;  %v1273_v35 = vpack.c.bf16 %v1018_v34, %v1017_v33  ;;  %v1020_v37 = vld [vmem:[%s2040_s2 + $0x58] sm:$0xff]  ;;  %v1021_v39 = vld [vmem:[%s2040_s2 + $0x60] sm:$0xff]  ;;  %v1022_v40 = vld [vmem:[%s2040_s2 + $0x68] sm:$0xff] }
  0x6d   :  { %990 = vmatprep.subr.bf16.mxu0 %v1477_v63  ;;  %v1276_v38 = vpack.c.bf16 %v1020_v37, %v1019_v36  ;;  %v1279_v41 = vpack.c.bf16 %v1022_v40, %v1021_v39  ;;  %v1023_v42 = vld [vmem:[%s2040_s2 + $0x70] sm:$0xff]  ;;  %v1024_v43 = vld [vmem:[%s2040_s2 + $0x78] sm:$0xff]  ;;  %v1025_v45 = vld [vmem:[%s2040_s2 + $0x80] sm:$0xff] }
  0x6e   :  { %v1282_v44 = vpack.c.bf16 %v1024_v43, %v1023_v42  ;;  %v1026_v46 = vld [vmem:[%s2040_s2 + $0x88] sm:$0xff]  ;;  %v1027_v48 = vld [vmem:[%s2040_s2 + $0x90] sm:$0xff]  ;;  %v1028_v49 = vld [vmem:[%s2040_s2 + $0x98] sm:$0xff] }
  0x6f   :  { %909 = vmatpush1.bf16.msra.mxu1 %v1472_v0  ;;  %v1285_v47 = vpack.c.bf16 %v1026_v46, %v1025_v45  ;;  %v1288_v50 = vpack.c.bf16 %v1028_v49, %v1027_v48  ;;  %v1029_v51 = vld [vmem:[%s2040_s2 + $0xa0] sm:$0xff]  ;;  %v1030_v52 = vld [vmem:[%s2040_s2 + $0xa8] sm:$0xff]  ;;  %v1031_v54 = vld [vmem:[%s2040_s2 + $0xb0] sm:$0xff] }
  0x70   :  { %991 = vmatpush1.bf16.msra.mxu0 %v1475_v1  ;;  %910 = vmatprep.subr.bf16.mxu1 %v1480_v2  ;;  %v1291_v53 = vpack.c.bf16 %v1030_v52, %v1029_v51  ;;  %v1032_v55 = vld [vmem:[%s2040_s2 + $0xb8] sm:$0xff]  ;;  %s1528_s2 = smov [#allocation2]  }
  0x71   :  { %992 = vmatprep.subr.bf16.mxu0 %v1483_v3  ;;  %v1294_v56 = vpack.c.bf16 %v1032_v55, %v1031_v54  ;;  %v1258_v3 = vld [vmem:[%s2041_s3] ss:$0 sm:$0xff]  ;;  %s1122_s27 = sshll.u32 %s1528_s2, 4  ;;  %s1123_s27 = int_to_ptr.vmem [resolvable:$true] %s1122_s27 }
  0x72   :  { %s1502_s28 = scalar_lea.vmem %s1123_s27, 32  ;;  %p1507_p1 = scmp.lt.s32.totalorder %s1123_s27, %s1123_s27 }
  0x73   :  { %911 = vmatpush1.bf16.msra.mxu1 %v1478_v4  ;;  %p1503_p0 = scmp.ne.s32.totalorder %s1123_s27, %s1502_s28  ;;  %p1508_p2 = scmp.lt.s32.totalorder %s1502_s28, %s1502_s28 }
  0x74   :  { %993 = vmatpush1.bf16.msra.mxu0 %v1481_v5  ;;  %912 = vmatprep.subr.bf16.mxu1 %v1486_v6 }
  0x75   :  { %994 = vmatprep.subr.bf16.mxu0 %v1489_v7  ;;  %p1509_p3 = por %p1508_p2, %p1507_p1 }
  0x77   :  { %913 = vmatpush1.bf16.msra.mxu1 %v1484_v8  ;;  %p1510_p4 = pnand %p1509_p3, %p1503_p0 }
  0x78   :  { %995 = vmatpush1.bf16.msra.mxu0 %v1487_v9  ;;  %914 = vmatprep.subr.bf16.mxu1 %v1492_v10 }
  0x79   :  { %996 = vmatprep.subr.bf16.mxu0 %v1495_v11 }
  0x7b   :  { %915 = vmatpush1.bf16.msra.mxu1 %v1490_v12 }
  0x7c   :  { %997 = vmatpush1.bf16.msra.mxu0 %v1493_v13  ;;  %916 = vmatprep.subr.bf16.mxu1 %v1498_v14 }
  0x7d   :  { %998 = vmatprep.subr.bf16.mxu0 %v1501_v15 }
  0x7f   :  { %917 = vmatpush1.bf16.msra.mxu1 %v1496_v16 }
  0x80   :  { %999 = vmatpush1.bf16.msra.mxu0 %v1499_v19  ;;  %1260 = vmatprep.subr.bf16.mxu1 %v1527_v25 }
  0x82   :  { %919 = vmatmul.mubr.bf16.vlgmr.msra.gmra.mrb[0].mxu1 %v193_v22 }
  0x83   :  { %1001 = vmatmul.mubr.bf16.vlgmr.msra.gmra.mrb[0].mxu0 %v194_v23  ;;  %1262 = vmatpush1.bf16.msra.mxu1 %v1261_v24 }
  0x84   :  { %1263 = vmatprep.subr.bf16.mxu1 %v1527_v25 }
  0x87   :  { %1265 = vmatpush1.bf16.msra.mxu1 %v1264_v17 }
  0x88   :  { %1266 = vmatprep.subr.bf16.mxu1 %v1527_v25 }
  0x8b   :  { %1268 = vmatpush1.bf16.msra.mxu1 %v1267_v29 }
  0x8c   :  { %1269 = vmatprep.subr.bf16.mxu1 %v1527_v25 }
  0x8f   :  { %1271 = vmatpush1.bf16.msra.mxu1 %v1270_v32 }
  0x90   :  { %1272 = vmatprep.subr.bf16.mxu1 %v1527_v25 }
  0x93   :  { %1274 = vmatpush1.bf16.msra.mxu1 %v1273_v35 }
  0x94   :  { %1275 = vmatprep.subr.bf16.mxu1 %v1527_v25 }
  0x97   :  { %1277 = vmatpush1.bf16.msra.mxu1 %v1276_v38 }
  0x98   :  { %1278 = vmatprep.subr.bf16.mxu1 %v1527_v25 }
  0x9b   :  { %1280 = vmatpush1.bf16.msra.mxu1 %v1279_v41 }
  0x9c   :  { %1281 = vmatprep.subr.bf16.mxu1 %v1527_v25 }
  0x9f   :  { %1283 = vmatpush1.bf16.msra.mxu1 %v1282_v44 }
  0xa0   :  { %1284 = vmatprep.subr.bf16.mxu1 %v1527_v25 }
  0xa3   :  { %1286 = vmatpush1.bf16.msra.mxu1 %v1285_v47 }
  0xa4   :  { %1287 = vmatprep.subr.bf16.mxu1 %v1527_v25 }
  0xa7   :  { %1289 = vmatpush1.bf16.msra.mxu1 %v1288_v50 }
  0xa8   :  { %1290 = vmatprep.subr.bf16.mxu1 %v1527_v25 }
  0xab   :  { %1292 = vmatpush1.bf16.msra.mxu1 %v1291_v53 }
  0xac   :  { %1293 = vmatprep.subr.bf16.mxu1 %v1527_v25 }
  0xaf   :  { %1295 = vmatpush1.bf16.msra.mxu1 %v1294_v56 }
 0x155   :  { %v920_v57 = vpop.f32.mrb[0].mxu1 }
 0x156   :  { %v1002_v58 = vpop.f32.mrb[0].mxu0  ;;  %v922_v60 = vpop.f32.mrb[1].mxu1 }
 0x157   :  { %v1296_v59 = vadd.f32 %v1002_v58, %v920_v57  ;;  %v1004_v61 = vpop.f32.mrb[1].mxu0  ;;  %v924_v63 = vpop.f32.mrb[2].mxu1 }
 0x158   :  { %v1297_v62 = vadd.f32 %v1004_v61, %v922_v60  ;;  %v1006_v0 = vpop.f32.mrb[2].mxu0  ;;  %v925_v1 = vpop.f32.mrb[3].mxu1 }
 0x159   :  { %v1007_v2 = vpop.f32.mrb[3].mxu0 }
 0x15a   :  { %1259 = vmatprep.mubr.msk.f32.mxu1 %vm1040_vm0, %v1297_v62 }
 0x15b   :  { %1109 = vmatmul.mubr.f32.vlgmr.msra.gmra.mrb[4].mxu1 %v1296_v59 }
 0x22e   :  { %v1110_v4 = vpop.f32.mrb[4].mxu1 }
 0x22f   :  { %v1111_v5 = vadd.f32 %v1258_v3, %v1110_v4  ;;  %v1112_v6 = vpop.f32.mrb[5].mxu1 }
 0x231   :  { %1115 = vst.msk [vmem:[#allocation2] sm:$0x3] %vm1114_vm1, %v1111_v5 }
 0x232   :  { %1513 = shalt.err (!%p1510_p4)
}
 0x233   :  { %s1514_s5 = scalar_lea.hbm %s2042_s4, 32 }
 0x234   :  { %p1515_p5 = scmp.ne.s32.totalorder %s2042_s4, %s1514_s5  ;;  %p1518_p6 = scmp.lt.u32.totalorder %s1514_s5, %s2042_s4 }
 0x236   :  { %p1520_p7 = pnand %p1518_p6, %p1515_p5 }
 0x238   :  { %1523 = shalt.err (!%p1520_p7)
}
 0x239   :  { %1125 = dma.vmem_to_hbm [thread:$0]  %s1123_s27, 32, %s2042_s4, [#allocation3]  }
 0x23a   :  { %1524 = dma.done.wait [#allocation3], 32  }
 0x23b   :  { %1525 = vsyncadd [#allocation3], 4294967264 }
 0x23c   :  { %1129 = vsyncpa [#allocation3], 1 }

</bundles_post_ra>
